<compile_context>
chip_gen: v6e
topology: v6e:2x2x1
jax: 0.10.0
libtpu: 0.0.40
codegen_flags: <defaults>
</compile_context>

<pallas_src>
import functools

import jax
import jax.numpy as jnp
from jax.experimental import pallas as pl
from jax.experimental.pallas import tpu as pltpu


def _round_up(x: int, m: int) -> int:
    return ((x + m - 1) // m) * m


def _sparse_linear_kernel(occ_ref, x_ref, w_ref, b_ref, o_ref, acc_ref):
    """One (tm, tn) output tile; grid = (M-blocks, N-blocks, K-blocks)."""
    j = pl.program_id(1)           # N-block index
    k = pl.program_id(2)           # K-block index (reduction axis, last)
    nk = pl.num_programs(2)

    @pl.when(k == 0)
    def _init():
        acc_ref[...] = jnp.zeros_like(acc_ref)

    # Structural sparsity: skip the MXU work entirely for all-zero weight blocks.
    @pl.when(occ_ref[j * nk + k] != 0)
    def _accumulate():
        acc_ref[...] += jnp.dot(x_ref[...], w_ref[...],
                                preferred_element_type=jnp.float32)

    # Bias added exactly once, in f32, right before the single lane-dense store.
    @pl.when(k == nk - 1)
    def _epilogue():
        o_ref[...] = (acc_ref[...] + b_ref[...].astype(jnp.float32)).astype(o_ref.dtype)


@functools.partial(jax.jit, static_argnames=("n_out", "tn", "tk", "tm"))
def sparse_linear_forward(x, w_kn, bias, occ, *, n_out, tn, tk, tm=128):
    """x: [M, K]; w_kn: [Kp, Np] pre-masked, pre-transposed, padded; bias: [1, Np] f32;
    occ: int32 [nj*nk] block-occupancy table (j-major). Returns f32 [M, n_out]."""
    M, K = x.shape
    Kp, Np = w_kn.shape

    tm_ = min(tm, _round_up(M, 8))
    Mp = _round_up(M, tm_)

    # Match the MXU compute dtype chosen at build time; pad M/K to tile multiples.
    x = x.astype(w_kn.dtype)
    if (Mp, Kp) != (M, K):
        x = jnp.pad(x, ((0, Mp - M), (0, Kp - K)))

    grid = (Mp // tm_, Np // tn, Kp // tk)

    # Explicit VMEM budget from the tile sizes (double-buffered in/out + acc).
    itemsize = jnp.dtype(w_kn.dtype).itemsize
    tile_bytes = (2 * (tm_ * tk + tk * tn + tn) * itemsize   # x, w, bias (2 bufs)
                  + 2 * tm_ * tn * 4                         # output (2 bufs, f32)
                  + tm_ * tn * 4)                            # accumulator scratch
    vmem_limit = int(min(48 * 1024 * 1024, max(2 * tile_bytes, 32 * 1024 * 1024)))

    out = pl.pallas_call(
        _sparse_linear_kernel,
        out_shape=jax.ShapeDtypeStruct((Mp, Np), jnp.float32),
        grid_spec=pltpu.PrefetchScalarGridSpec(
            num_scalar_prefetch=1,            # occupancy table -> SMEM
            grid=grid,
            in_specs=[
                pl.BlockSpec((tm_, tk), lambda i, j, k, occ: (i, k)),   # x tile
                pl.BlockSpec((tk, tn), lambda i, j, k, occ: (k, j)),    # w tile [K, N]
                pl.BlockSpec((1, tn), lambda i, j, k, occ: (0, j)),     # bias tile
            ],
            out_specs=pl.BlockSpec((tm_, tn), lambda i, j, k, occ: (i, j)),
            scratch_shapes=[pltpu.VMEM((tm_, tn), jnp.float32)],
        ),
        compiler_params=pltpu.CompilerParams(
            dimension_semantics=("parallel", "parallel", "arbitrary"),
            vmem_limit_bytes=vmem_limit,
        ),
    )(occ, x, w_kn, bias)

    return out[:M, :n_out]


class SparseOperator:
    """JAX analogue of sparta SparseOperator base, concretized as sparse linear.

    forward(*inputs) dispatches to self.forward_func, which is built in
    _set_forward() after set_mask()/build() -- mirroring the PyTorch module.
    """

    # Tile sizes: 128-aligned (lane-dense output, MXU-friendly) on all gens;
    # small enough to fit comfortably in v7x's 64 MiB VMEM as well.
    TM, TN, TK = 128, 128, 256

    def __init__(self, in_features: int, out_features: int,
                 compressed: bool = False, compute_dtype=jnp.float32):
        self._compressed = compressed
        self.compute_dtype = compute_dtype
        self.kernel_groups = {}   # TODO(synk): KernelGroup tuning is host-side glue; no Pallas equivalent.
        self.ports = {}           # TODO(synk): Port sample-data plumbing is host-side only.
        self._sparse_port = None
        self.forward_func = None

        # Deterministic parameter init (synthetic; no checkpoint load).
        kw = jax.random.PRNGKey(42)
        k_w, k_b = jax.random.split(kw)
        scale = 1.0 / jnp.sqrt(jnp.float32(in_features))
        self.weight = jax.random.uniform(
            k_w, (out_features, in_features), jnp.float32, -scale, scale)
        self.bias = jax.random.uniform(
            k_b, (1, out_features), jnp.float32, -scale, scale)
        self.mask = jnp.ones((out_features, in_features), jnp.float32)

    def set_mask(self, mask):
        self.mask = mask.astype(jnp.float32)

    def build(self, config=None, sample_inputs=None):
        # TODO(synk): config search / KernelGroup.build has no Pallas equivalent;
        # we always build the single tiled Pallas kernel.
        self._post_build()

    def _post_build(self):
        self._set_forward()
        for port in self.ports.values():
            port.clear_data()

    def _set_forward(self):
        N, K = self.weight.shape
        tn = min(self.TN, _round_up(N, 128))
        tk = min(self.TK, _round_up(K, 128))
        Np, Kp = _round_up(N, tn), _round_up(K, tk)

        # Fold the (static-after-build) mask into the weight ONCE, pre-transpose
        # to [K, N] so the kernel contracts on K without an in-kernel transpose,
        # and cast to the MXU compute dtype (bf16 recommended on v6e/v7x).
        w_kn = (self.weight * self.mask).T.astype(self.compute_dtype)
        w_kn = jnp.pad(w_kn, ((0, Kp - K), (0, Np - N)))
        bias = jnp.pad(self.bias.astype(jnp.float32), ((0, 0), (0, Np - N)))

        # Per-(N-block, K-block) occupancy table -> genuine block-sparse skipping.
        mask_kn = jnp.pad(self.mask.T, ((0, Kp - K), (0, Np - N)))
        occ2d = (mask_kn.reshape(Kp // tk, tk, Np // tn, tn) != 0).any(axis=(1, 3))
        occ = occ2d.T.reshape(-1).astype(jnp.int32)   # flattened [nj * nk], j-major

        n_out = N
        self.forward_func = lambda x: sparse_linear_forward(
            x, w_kn, bias, occ, n_out=n_out, tn=tn, tk=tk, tm=self.TM)

    def forward(self, *inputs):
        return self.forward_func(*inputs)

    def __call__(self, *inputs):
        return self.forward(*inputs)


if __name__ == "__main__":
    M, K, N = 128, 512, 384   # exercises a real (1, 3, 2) tiled grid

    key = jax.random.PRNGKey(0)
    k_x, k_blk, k_fine = jax.random.split(key, 3)
    x = jax.random.normal(k_x, (M, K), jnp.float32)

    # Block-structured sparsity at the kernel's (tn=128, tk=256) granularity:
    # whole-zero blocks are skipped on the MXU; surviving blocks also carry
    # fine-grained elementwise sparsity (handled by the mask folded into W).
    nb_n, nb_k = N // 128, K // 256
    block_keep = (jax.random.uniform(k_blk, (nb_n, nb_k)) > 0.4).astype(jnp.float32)
    block_mask = jnp.repeat(jnp.repeat(block_keep, 128, axis=0), 256, axis=1)
    fine = (jax.random.uniform(k_fine, (N, K)) > 0.3).astype(jnp.float32)
    mask = block_mask * fine

    # --- f32 path (strict reference check) ---
    op = SparseOperator(in_features=K, out_features=N, compressed=False)
    op.set_mask(mask)
    op.build()
    y = jax.block_until_ready(op(x))

    w_masked = op.weight * op.mask
    y_ref = jnp.dot(x, w_masked.T, precision=jax.lax.Precision.HIGHEST) + op.bias
    assert y.shape == (M, N)
    assert jnp.allclose(y, y_ref, atol=1e-4, rtol=1e-4), float(jnp.abs(y - y_ref).max())

    # --- bf16 MXU-operand path (v6e/v7x optimization), f32 accumulation ---
    op16 = SparseOperator(in_features=K, out_features=N, compute_dtype=jnp.bfloat16)
    op16.set_mask(mask)
    op16.build()
    y16 = jax.block_until_ready(op16(x))

    x16 = x.astype(jnp.bfloat16).astype(jnp.float32)
    w16 = w_masked.astype(jnp.bfloat16).astype(jnp.float32)
    y16_ref = jnp.dot(x16, w16.T, precision=jax.lax.Precision.HIGHEST) + op.bias
    assert y16.shape == (M, N)
    assert jnp.allclose(y16, y16_ref, atol=5e-2, rtol=5e-2), float(jnp.abs(y16 - y16_ref).max())

    print("KERNEL_OK")
</pallas_src>

<mosaic_0001>
module attributes {stable_mosaic.version = 11 : i64} {
  func.func @_sparse_linear_kernel(%arg0: i32, %arg1: i32, %arg2: i32, %arg3: memref<6xi32, #tpu.memory_space<smem>>, %arg4: memref<128x256xf32, #tpu.memory_space<vmem>>, %arg5: memref<256x128xf32, #tpu.memory_space<vmem>>, %arg6: memref<1x128xf32, #tpu.memory_space<vmem>>, %arg7: memref<128x128xf32, #tpu.memory_space<vmem>>, %arg8: memref<128x128xf32, #tpu.memory_space<vmem>>) attributes {dimension_semantics = [#tpu.dimension_semantics<parallel>, #tpu.dimension_semantics<parallel>, #tpu.dimension_semantics<arbitrary>], iteration_bounds = array<i64: 1, 3, 2>, scalar_prefetch = 1 : i64, scratch_operands = 1 : i64, tpu.core_type = #tpu.core_type<tc>, window_params = [{transform_indices = @transform_0, window_bounds = array<i64: 128, 256>}, {transform_indices = @transform_1, window_bounds = array<i64: 256, 128>}, {transform_indices = @transform_2, window_bounds = array<i64: 1, 128>}, {transform_indices = @transform_3, window_bounds = array<i64: 128, 128>}]} {
    %c0_i32 = arith.constant 0 : i32
    %0 = arith.cmpi eq, %arg2, %c0_i32 : i32
    %1 = arith.extui %0 : i1 to i32
    %c0_i32_0 = arith.constant 0 : i32
    %2 = arith.cmpi ne, %1, %c0_i32_0 : i32
    scf.if %2 {
      %cst = arith.constant 0.000000e+00 : f32
      %13 = vector.broadcast %cst : f32 to vector<128x128xf32>
      %c0 = arith.constant 0 : index
      %c0_4 = arith.constant 0 : index
      %14 = vector.load %arg8[%c0, %c0_4] : memref<128x128xf32, #tpu.memory_space<vmem>>, vector<128x128xf32>
      tpu.vector_store %arg8[%c0, %c0_4], %13 {strides = array<i32>} : memref<128x128xf32, #tpu.memory_space<vmem>>, vector<128x128xf32>,
    } else {
    }
    %c2_i32 = arith.constant 2 : i32
    %3 = arith.muli %arg1, %c2_i32 : i32
    %4 = arith.addi %3, %arg2 : i32
    %5 = arith.index_cast %4 : i32 to index
    %6 = memref.load %arg3[%5] : memref<6xi32, #tpu.memory_space<smem>>
    %c0_i32_1 = arith.constant 0 : i32
    %7 = arith.cmpi ne, %6, %c0_i32_1 : i32
    %8 = arith.extui %7 : i1 to i32
    %c0_i32_2 = arith.constant 0 : i32
    %9 = arith.cmpi ne, %8, %c0_i32_2 : i32
    scf.if %9 {
      %c0 = arith.constant 0 : index
      %c0_4 = arith.constant 0 : index
      %13 = vector.load %arg8[%c0, %c0_4] : memref<128x128xf32, #tpu.memory_space<vmem>>, vector<128x128xf32>
      %c0_5 = arith.constant 0 : index
      %c0_6 = arith.constant 0 : index
      %14 = vector.load %arg4[%c0_5, %c0_6] : memref<128x256xf32, #tpu.memory_space<vmem>>, vector<128x256xf32>
      %c0_7 = arith.constant 0 : index
      %c0_8 = arith.constant 0 : index
      %15 = vector.load %arg5[%c0_7, %c0_8] : memref<256x128xf32, #tpu.memory_space<vmem>>, vector<256x128xf32>
      %cst = arith.constant dense<0.000000e+00> : vector<128x128xf32>
      %16 = tpu.matmul %14, %15, %cst {dimension_numbers = #tpu.dot_dimension_numbers<[1], [0], [0], [1], [0, 0, 1, 1], [], []>} : vector<128x256xf32>, vector<256x128xf32>, vector<128x128xf32> -> vector<128x128xf32>
      %17 = arith.addf %13, %16 : vector<128x128xf32>
      %c0_9 = arith.constant 0 : index
      %c0_10 = arith.constant 0 : index
      %18 = vector.load %arg8[%c0_9, %c0_10] : memref<128x128xf32, #tpu.memory_space<vmem>>, vector<128x128xf32>
      tpu.vector_store %arg8[%c0_9, %c0_10], %17 {strides = array<i32>} : memref<128x128xf32, #tpu.memory_space<vmem>>, vector<128x128xf32>,
    } else {
    }
    %c1_i32 = arith.constant 1 : i32
    %10 = arith.cmpi eq, %arg2, %c1_i32 : i32
    %11 = arith.extui %10 : i1 to i32
    %c0_i32_3 = arith.constant 0 : i32
    %12 = arith.cmpi ne, %11, %c0_i32_3 : i32
    scf.if %12 {
      %c0 = arith.constant 0 : index
      %c0_4 = arith.constant 0 : index
      %13 = vector.load %arg8[%c0, %c0_4] : memref<128x128xf32, #tpu.memory_space<vmem>>, vector<128x128xf32>
      %c0_5 = arith.constant 0 : index
      %c0_6 = arith.constant 0 : index
      %14 = vector.load %arg6[%c0_5, %c0_6] : memref<1x128xf32, #tpu.memory_space<vmem>>, vector<1x128xf32>
      %15 = vector.broadcast %14 : vector<1x128xf32> to vector<128x128xf32>
      %16 = arith.addf %13, %15 : vector<128x128xf32>
      %c0_7 = arith.constant 0 : index
      %c0_8 = arith.constant 0 : index
      %17 = vector.load %arg7[%c0_7, %c0_8] : memref<128x128xf32, #tpu.memory_space<vmem>>, vector<128x128xf32>
      tpu.vector_store %arg7[%c0_7, %c0_8], %16 {strides = array<i32>} : memref<128x128xf32, #tpu.memory_space<vmem>>, vector<128x128xf32>,
    } else {
    }
    return
  }
  func.func @transform_0(%arg0: i32, %arg1: i32, %arg2: i32, %arg3: memref<6xi32, #tpu.memory_space<smem>>) -> (i32, i32) {
    %c0_i32 = arith.constant 0 : i32
    return %arg0, %arg2 : i32, i32
  }
  func.func @transform_1(%arg0: i32, %arg1: i32, %arg2: i32, %arg3: memref<6xi32, #tpu.memory_space<smem>>) -> (i32, i32) {
    %c0_i32 = arith.constant 0 : i32
    return %arg2, %arg1 : i32, i32
  }
  func.func @transform_2(%arg0: i32, %arg1: i32, %arg2: i32, %arg3: memref<6xi32, #tpu.memory_space<smem>>) -> (i32, i32) {
    %c0_i32 = arith.constant 0 : i32
    %c0_i32_0 = arith.constant 0 : i32
    return %c0_i32, %arg1 : i32, i32
  }
  func.func @transform_3(%arg0: i32, %arg1: i32, %arg2: i32, %arg3: memref<6xi32, #tpu.memory_space<smem>>) -> (i32, i32) {
    %c0_i32 = arith.constant 0 : i32
    return %arg0, %arg1 : i32, i32
  }
}

</mosaic_0001>

<bundles_post_ra>
// kernel: sparse_linear_forward.1
= control target key start
LH: loop header
LB: loop body
LE: loop exit
PB: predicated region body
PF: predicated region fallthrough
CT: control target
= control target key end

     0   :  { %s1716_s0 = inlined_call_operand.vmem [shape: s32[6], index: 0, kind: input, shape index: {}]   ;;  %s1717_s1 = inlined_call_operand.hbm [shape: f32[128,512], index: 1, kind: input, shape index: {}]   ;;  %s1718_s2 = inlined_call_operand.hbm [shape: f32[512,384], index: 2, kind: input, shape index: {}]   ;;  %s1719_s3 = inlined_call_operand.vmem [shape: f32[1,384], index: 3, kind: input, shape index: {}]   ;;  %s1720_s4 = inlined_call_operand.hbm [shape: f32[128,384], index: 4, kind: output, shape index: {}]  }
   0x1   :  { %1728 = sst [smem:[#allocation21_spill]] %s1717_s1  ;;  %s9_s17 = sshll.u32 %s1716_s0, 4  ;;  %s10_s17 = int_to_ptr.vmem [resolvable:$true] %s9_s17 }
   0x2   :  { %1729 = sst [smem:[#allocation22_spill]] %s1719_s3  ;;  %s1049_s18 = scalar_lea.vmem %s10_s17, 16 }
   0x3   :  { %1730 = sst [smem:[#allocation23_spill]] %s1720_s4  ;;  %p1050_p0 = scmp.ne.s32.totalorder %s10_s17, %s1049_s18 }
   0x4   :  { %p1054_p1 = scmp.lt.s32.totalorder %s10_s17, %s10_s17  ;;  %p1055_p2 = scmp.lt.s32.totalorder %s1049_s18, %s1049_s18 }
   0x6   :  { %p1056_p3 = por %p1055_p2, %p1054_p1 }
   0x8   :  { %p1057_p4 = pnand %p1056_p3, %p1050_p0 }
   0xa   :  { %1060 = shalt.err (!%p1057_p4)  }
   0xb   :  { %s1269_s19 = smov [#allocation4]  }
   0xc   :  { %12 = dma.vmem_to_smem %s10_s17, 16, %s1269_s19, [#allocation3] }
   0xd   :  { %1199 = dma.done.wait [#allocation3], 16 }
   0xe   :  { %1200 = vsyncadd [#allocation3], 4294967280 }
   0xf   :  { %14 = sfence }
  0x10   :  { %15 = vsyncpa [#allocation6], 0 }
  0x11   :  { %17 = vsyncpa [#allocation6 + $0x1], 0 }
  0x12   :  { %18 = vsyncpa [#allocation9], 0 }
  0x13   :  { %20 = vsyncpa [#allocation9 + $0x1], 0 }
  0x14   :  { %21 = vsyncpa [#allocation7], 0 }
  0x15   :  { %23 = vsyncpa [#allocation7 + $0x1], 0  ;;  %s1311_s0 = smov 0   ;;  %s1313_s20 = smov 0  }
  0x16   :  { %s1315_s21 = smov 0   ;;  %s1317_s22 = smov 0  }
  0x17   :  { %s1319_s23 = smov 0   ;;  %s1321_s24 = smov 0  }
  0x18   :  { %s1323_s25 = smov 0   ;;  %s1325_s26 = smov 0  }
  0x19   :  { %s1327_s27 = smov 0   ;;  %s1329_s28 = smov 0  }
  0x1a   :  { %s1331_s29 = smov 0   ;;  %s1333_s30 = smov 0  }
  0x1b   :  { %s1335_s5 = smov 0   ;;  %s1337_s6 = smov 0  }
  0x1c LB: > { %1731 = sst [smem:[#allocation15_spill]] %s1247_s27  ;;  %s769_s7 = sadd.s32 4294967295, %s1267_s6   ;;  %s1267_s6 = sphi %s1337_s6, %s29_s6   ;;  %s1263_s5 = sphi %s1335_s5, %s1774_s5   ;;  %s1259_s30 = sphi %s1333_s30, %s1762_s30   ;;  %s1255_s29 = sphi %s1331_s29, %s1773_s29   ;;  %s1251_s28 = sphi %s1329_s28, %s1761_s28   ;;  %s1247_s27 = sphi %s1327_s27, %s1760_s27   ;;  %s1243_s26 = sphi %s1325_s26, %s1772_s26   ;;  %s1239_s25 = sphi %s1323_s25, %s1771_s25   ;;  %s1235_s24 = sphi %s1321_s24, %s1770_s24   ;;  %s1231_s23 = sphi %s1319_s23, %s1769_s23   ;;  %s1227_s22 = sphi %s1317_s22, %s1768_s22   ;;  %s1223_s21 = sphi %s1315_s21, %s1767_s21   ;;  %s1219_s20 = sphi %s1313_s20, %s1766_s20   ;;  %s1215_s0 = sphi %s1311_s0, %s1765_s0  }
  0x1d   : > { %1732 = sst [smem:[#allocation16_spill]] %s1251_s28  ;;  %s41_s8 = sadd.s32 1, %s1259_s30 }
  0x1e   : > { %1733 = sst [smem:[#allocation17_spill]] %s1259_s30  ;;  %p1381_p5 = scmp.ge.s32.totalorder %s41_s8, 2 }
  0x1f   : > { %s57_s10 = sadd.s32 1, %s1247_s27  ;;  %p64_p6 = scmp.ne.s32.totalorder %s1247_s27, %s1243_s26 }
  0x20   : > { %p1724_p7 = scmp.eq.s32.totalorder %s1267_s6, 0  ;;  %s1776_s8 = smov (%p1381_p5, %s41_s8), 0 }
  0x21   : > { %1735 = sst [smem:[#allocation18_spill]] %s1776_s8  ;;  %p70_p9 = scmp.ne.s32.totalorder %s1243_s26, %s1239_s25 }
  0x22   : > { %p1395_p8 = por %p1724_p7, %p64_p6  ;;  %s1402_s12 = ssub.s32 %s1259_s30, %s1776_s8 }
  0x23   : > { %p1404_p10 = scmp.eq.s32.totalorder %s769_s7, 0  ;;  %p55_p11 = scmp.eq.s32.totalorder %s1402_s12, 0 }
  0x24   : > { %p1409_p12 = scmp.eq.s32.totalorder %s769_s7, 5  ;;  %p924_p0 = scmp.lt.s32.totalorder %s1267_s6, 6 }
  0x25   : > { %p1415_p13 = por %p1404_p10, %p70_p9  ;;  %s176_s17 = sand.u32 1, %s1247_s27  }
  0x26   : > { %s1420_s16 = scalar_select %p55_p11, %s1247_s27, %s57_s10  }
  0x27   : > { %s1739_s15 = scalar_select %p1415_p13, 1, 0 }
  0x28   : > { %1740 = sst [smem:[#allocation19_spill]] %s1420_s16  ;;  %s773_s18 = sshll.u32 %s176_s17, 8 }
  0x29   : > { %s793_s19 = sshll.u32 %s1259_s30, 8  ;;  %s1741_s1 = sld [smem:[#allocation21_spill]] }
  0x2a   : > { %s180_s28 = scalar_lea.vmem [#allocation5], %s773_s18  ;;  %p1432_p1 = pnand %p924_p0, %p1395_p8 }
  0x2b   : > { %s190_s7 = sshll.u32 %s180_s28, 4  ;;  %s177_s10 = scalar_lea.sflag [#allocation6], %s176_s17  ;;  %s191_s7 = int_to_ptr.vmem [resolvable:$true] %s190_s7 }
  0x2c   : > { %p1063_p2 = pneg %p1432_p1  ;;  %s1074_s16 = scalar_lea.vmem %s191_s7, 4096 }
  0x2d   : > { %p1075_p3 = scmp.ne.s32.totalorder %s191_s7, %s1074_s16  ;;  %s1270_s27 = smov [#allocation5]  }
  0x2e   : > { %s1079_s8 = sshll.u32 %s1270_s27, 4  ;;  %s1080_s8 = int_to_ptr.vmem [resolvable:$false] %s1079_s8 }
  0x2f   : > { %s189_s4 = scalar_lea.hbm %s1741_s1, %s793_s19  ;;  %p1077_p4 = pnand %p1075_p3, %p1063_p2 }
  0x30   : > { %s1081_s18 = scalar_lea.vmem %s1080_s8, 8192  ;;  %p1082_p9 = scmp.lt.s32.totalorder %s191_s7, %s1080_s8 }
  0x31   : > { %p1078_p6 = pneg %p1077_p4  ;;  %p1083_p11 = scmp.lt.s32.totalorder %s1081_s18, %s1074_s16 }
  0x33   : > { %p1084_p7 = por %p1083_p11, %p1082_p9 }
  0x35   : > { %p1085_p13 = pnand %p1084_p7, %p1078_p6 }
  0x37   : > { %1088 = shalt.err (!%p1085_p13)
}
  0x38   : > { %s1271_s28 = smov 512   ;;  %s1272_s27 = smov 256  }
  0x39   : > { %s1273_s11 = smov 16   ;;  %p780_p7 = scmp.ge.s32.totalorder %s1267_s6, 1 }
  0x3a   : > { %916 = dma.hbm_to_vmem [thread:$0]  (!%p1432_p1), %s189_s4, 4096, %s191_s7, %s177_s10, %s1271_s28, %s1272_s27, %s1273_s11  }
  0x3b   : > { %p227_p8 = scmp.lt.s32.totalorder %s1267_s6, 7  ;;  %s770_s17 = sadd.s32 4294967294, %s1267_s6  }
  0x3c   : > { %s44_s19 = sadd.s32 1, %s1263_s5  ;;  %s85_s25 = sadd.s32 1, %s1235_s24 }
  0x3d   : > { %p1442_p13 = pnand %p780_p7, %p227_p8  ;;  %s1778_s19 = smov (!%p1381_p5, %s44_s19), %s1263_s5 }
  0x3e   : > { %p92_p2 = scmp.ne.s32.totalorder %s1235_s24, %s1231_s23  ;;  %p98_p1 = scmp.ne.s32.totalorder %s1231_s23, %s1227_s22 }
  0x3f   : > { %p46_p3 = scmp.ge.s32.totalorder %s1778_s19, 3  ;;  %s139_s3 = sadd.s32 1, %s1223_s21 }
  0x40   : > { %p1744_p4 = scmp.eq.s32.totalorder %s1267_s6, 0  ;;  %p1465_p9 = por %p98_p1, %p1404_p10 }
  0x41   : > { %s1780_s19 = smov (%p46_p3, %s1778_s19), 0  ;;  %p149_p5 = scmp.ne.s32.totalorder %s1223_s21, %s1219_s20 }
  0x42   : > { %p1459_p6 = por %p92_p2, %p1744_p4  ;;  %1747 = sst [smem:[#allocation20_spill]] %s1780_s19 }
  0x43   : > { %p155_p11 = scmp.ne.s32.totalorder %s1219_s20, %s1215_s0  ;;  %s81_s22 = ssub.s32 %s1263_s5, %s1780_s19 }
  0x44   : > { %p156_p7 = scmp.eq.s32.totalorder %s770_s17, 5  ;;  %s82_s9 = sor.u32 %s81_s22, %s1402_s12 }
  0x45   : > { %p137_p8 = scmp.eq.s32.totalorder %s81_s22, 0  ;;  %p83_p2 = scmp.eq.s32.totalorder %s82_s9, 0 }
  0x46   : > { %p1480_p4 = por %p1409_p12, %p149_p5  ;;  %p1490_p10 = por %p156_p7, %p155_p11 }
  0x47   : > { %s1485_s10 = scalar_select %p137_p8, %s1223_s21, %s139_s3  }
  0x48   : > { %s1488_s8 = scalar_select %p83_p2, %s1235_s24, %s85_s25  }
  0x49   : > { %s200_s28 = sand.u32 1, %s1235_s24   ;;  %s906_s11 = smul.u32 96, %s1259_s30 }
  0x4a   : > { %s776_s27 = sshll.u32 %s200_s28, 8  ;;  %p1500_p1 = pnand %p924_p0, %p1459_p6 }
  0x4b   : > { %s204_s17 = scalar_lea.vmem [#allocation8], %s776_s27  ;;  %s210_s3 = sadd.s32 %s1263_s5, %s906_s11 }
  0x4c   : > { %s213_s12 = sshll.u32 %s204_s17, 4  ;;  %s779_s25 = sshll.u32 %s210_s3, 7  ;;  %s214_s12 = int_to_ptr.vmem [resolvable:$true] %s213_s12 }
  0x4d   : > { %s212_s1 = scalar_lea.hbm %s1718_s2, %s779_s25  ;;  %s201_s19 = scalar_lea.sflag [#allocation9], %s200_s28 }
  0x4e   : > { %p1091_p12 = pneg %p1500_p1  ;;  %s1102_s30 = scalar_lea.vmem %s214_s12, 4096 }
  0x4f   : > { %p1103_p3 = scmp.ne.s32.totalorder %s214_s12, %s1102_s30  ;;  %s1274_s4 = smov [#allocation8]  }
  0x50   : > { %s1107_s27 = sshll.u32 %s1274_s4, 4  ;;  %s1108_s27 = int_to_ptr.vmem [resolvable:$false] %s1107_s27 }
  0x51   : > { %p1105_p5 = pnand %p1103_p3, %p1091_p12  ;;  %s1109_s17 = scalar_lea.vmem %s1108_s27, 8192 }
  0x52   : > { %p1110_p0 = scmp.lt.s32.totalorder %s214_s12, %s1108_s27  ;;  %p1111_p6 = scmp.lt.s32.totalorder %s1109_s17, %s1102_s30 }
  0x53   : > { %p1106_p11 = pneg %p1105_p5 }
  0x54   : > { %p1112_p7 = por %p1111_p6, %p1110_p0 }
  0x56   : > { %p1113_p8 = pnand %p1112_p7, %p1106_p11 }
  0x58   : > { %1116 = shalt.err (!%p1113_p8)
}
  0x59   : > { %s1275_s11 = smov 384   ;;  %s1276_s3 = smov 128  }
  0x5a   : > { %s1277_s25 = smov 8   ;;  %231 = sbr.rel (%p1442_p13) target bundleno = 456 (0x1c8), region = 32 }
  0x5b   : > { %919 = dma.hbm_to_vmem [thread:$0]  (!%p1500_p1), %s212_s1, 4096, %s214_s12, %s201_s19, %s1275_s11, %s1276_s3, %s1277_s25  }
  0x5c   : > { %s233_s28 = sand.u32 (!%p1442_p13), 1, %s1243_s26   ;;  %p1751_p2 = scmp.ne.s32.totalorder (!%p1442_p13), %s1739_s15, 0 }
  0x5d   : > { %s781_s22 = sshll.u32 (!%p1442_p13), %s233_s28, 8  ;;  %s234_s9 = scalar_lea.sflag (!%p1442_p13), [#allocation6], %s233_s28 }
  0x5e   : > { %s1515_s4 = scalar_lea.vmem (!%p1442_p13), [#allocation5], %s781_s22 }
  0x5f   : > { %1202 = dma.done.wait (%p1751_p2), %s234_s9, 4096  }
  0x60   : > { %1204 = vsyncadd (%p1751_p2), %s234_s9, 4294963200  ;;  %s242_s30 = sand.u32 1, %s1231_s23  }
  0x61   : > { %s782_s14 = sshll.u32 %s242_s30, 8  ;;  %s243_s1 = scalar_lea.sflag [#allocation9], %s242_s30 }
  0x62   : > { %s1522_s19 = scalar_lea.vmem [#allocation8], %s782_s14 }
  0x63   : > { %1206 = dma.done.wait (%p1465_p9), %s243_s1, 4096  }
  0x64   : > { %1208 = vsyncadd (%p1465_p9), %s243_s1, 4294963200  ;;  %s274_s16 = sand.u32 1, %s1219_s20   ;;  %p280_p13 = scmp.lt.s32.totalorder %s1255_s29, 2 }
  0x65   : > { %s783_s15 = sshll.u32 %s274_s16, 7  ;;  %s1752_s11 = sld [smem:[#allocation22_spill]] }
  0x66   : > { %s1533_s12 = scalar_select %p280_p13, %s1255_s29, 2 }
  0x67   : > { %s1539_s25 = scalar_lea.vmem [#allocation10], %s783_s15  ;;  %s1753_s28 = sld [smem:[#allocation16_spill]] }
  0x6b   : > { %s282_s3 = scalar_lea.vmem %s1752_s11, %s1533_s12 }
  0x6d   : > { %p784_p1 = scmp.ne.s32.totalorder %s1753_s28, 0 }
  0x6f   : > { %287 = sbr.rel (%p784_p1) target bundleno = 125 (0x7d), region = 44 }
  0x74   : > { %v1278_v0 = vmov 0.0  }
  0x75   : > { %288 = vst [vmem:[#allocation2 + $0x30] sm:$0xff] %v1278_v0  ;;  %289 = vst [vmem:[#allocation2] sm:$0xff] %v1278_v0 }
  0x76   : > { %290 = vst [vmem:[#allocation2 + $0x58] sm:$0xff] %v1278_v0  ;;  %291 = vst [vmem:[#allocation2 + $0x18] sm:$0xff] %v1278_v0 }
  0x77   : > { %292 = vst [vmem:[#allocation2 + $0x50] sm:$0xff] %v1278_v0  ;;  %293 = vst [vmem:[#allocation2 + $0x68] sm:$0xff] %v1278_v0 }
  0x78   : > { %294 = vst [vmem:[#allocation2 + $0x8] sm:$0xff] %v1278_v0  ;;  %295 = vst [vmem:[#allocation2 + $0x48] sm:$0xff] %v1278_v0 }
  0x79   : > { %296 = vst [vmem:[#allocation2 + $0x40] sm:$0xff] %v1278_v0  ;;  %297 = vst [vmem:[#allocation2 + $0x20] sm:$0xff] %v1278_v0 }
  0x7a   : > { %298 = vst [vmem:[#allocation2 + $0x10] sm:$0xff] %v1278_v0  ;;  %299 = vst [vmem:[#allocation2 + $0x38] sm:$0xff] %v1278_v0 }
  0x7b   : > { %300 = vst [vmem:[#allocation2 + $0x60] sm:$0xff] %v1278_v0  ;;  %301 = vst [vmem:[#allocation2 + $0x70] sm:$0xff] %v1278_v0 }
  0x7c   : > { %302 = vst [vmem:[#allocation2 + $0x78] sm:$0xff] %v1278_v0  ;;  %303 = vst [vmem:[#allocation2 + $0x28] sm:$0xff] %v1278_v0 }
  0x7d PF: > { %s1754_s7 = sld [smem:[#allocation16_spill]]  ;;  %s785_s22 = sshll.u32 %s1255_s29, 1 }
  0x83   : > { %s305_s9 = sadd.s32 %s1754_s7, %s785_s22 }
  0x84   : > { %s306_s30 = sld [smem:[#allocation4 + %s305_s9]] }
  0x8a   : > { %p786_p9 = scmp.eq.s32.totalorder %s306_s30, 0 }
  0x8c   : > { %310 = sbr.rel (%p786_p9) target bundleno = 407 (0x197), region = 48 }
  0x91   : > { %v390_v1 = vld [vmem:[%s1522_s19 + $0xf8] sm:$0xff]  ;;  %v389_v3 = vld [vmem:[%s1522_s19 + $0xf0] sm:$0xff]  ;;  %v388_v5 = vld [vmem:[%s1522_s19 + $0xe8] sm:$0xff] }
  0x92   : > { %v374_v2 = vld [vmem:[%s1522_s19 + $0x78] sm:$0xff]  ;;  %794 = vmatprep.subr.mxu0 %v390_v1  ;;  %874 = vmatprep.subr.mxu1 %v390_v1  ;;  %v373_v4 = vld [vmem:[%s1522_s19 + $0x70] sm:$0xff]  ;;  %v372_v6 = vld [vmem:[%s1522_s19 + $0x68] sm:$0xff] }
  0x93   : > { %795 = vmatpush3.msra.mxu0 %v374_v2  ;;  %890 = vmatpush3.msra.mxu1 %v374_v2  ;;  %v387_v7 = vld [vmem:[%s1522_s19 + $0xe0] sm:$0xff]  ;;  %v386_v9 = vld [vmem:[%s1522_s19 + $0xd8] sm:$0xff]  ;;  %v385_v11 = vld [vmem:[%s1522_s19 + $0xd0] sm:$0xff] }
  0x94   : > { %796 = vmatprep.subr.mxu0 %v389_v3  ;;  %875 = vmatprep.subr.mxu1 %v389_v3  ;;  %v371_v8 = vld [vmem:[%s1522_s19 + $0x60] sm:$0xff]  ;;  %v370_v10 = vld [vmem:[%s1522_s19 + $0x58] sm:$0xff]  ;;  %v369_v12 = vld [vmem:[%s1522_s19 + $0x50] sm:$0xff] }
  0x95   : > { %797 = vmatpush3.msra.mxu0 %v373_v4  ;;  %891 = vmatpush3.msra.mxu1 %v373_v4  ;;  %v384_v13 = vld [vmem:[%s1522_s19 + $0xc8] sm:$0xff]  ;;  %v383_v15 = vld [vmem:[%s1522_s19 + $0xc0] sm:$0xff]  ;;  %v382_v17 = vld [vmem:[%s1522_s19 + $0xb8] sm:$0xff] }
  0x96   : > { %798 = vmatprep.subr.mxu0 %v388_v5  ;;  %876 = vmatprep.subr.mxu1 %v388_v5  ;;  %v368_v14 = vld [vmem:[%s1522_s19 + $0x48] sm:$0xff]  ;;  %v367_v16 = vld [vmem:[%s1522_s19 + $0x40] sm:$0xff]  ;;  %v366_v18 = vld [vmem:[%s1522_s19 + $0x38] sm:$0xff] }
  0x97   : > { %799 = vmatpush3.msra.mxu0 %v372_v6  ;;  %892 = vmatpush3.msra.mxu1 %v372_v6  ;;  %v381_v19 = vld [vmem:[%s1522_s19 + $0xb0] sm:$0xff]  ;;  %v380_v21 = vld [vmem:[%s1522_s19 + $0xa8] sm:$0xff]  ;;  %v379_v23 = vld [vmem:[%s1522_s19 + $0xa0] sm:$0xff] }
  0x98   : > { %800 = vmatprep.subr.mxu0 %v387_v7  ;;  %877 = vmatprep.subr.mxu1 %v387_v7  ;;  %v365_v20 = vld [vmem:[%s1522_s19 + $0x30] sm:$0xff]  ;;  %v364_v22 = vld [vmem:[%s1522_s19 + $0x28] sm:$0xff]  ;;  %v363_v24 = vld [vmem:[%s1522_s19 + $0x20] sm:$0xff] }
  0x99   : > { %801 = vmatpush3.msra.mxu0 %v371_v8  ;;  %893 = vmatpush3.msra.mxu1 %v371_v8  ;;  %v378_v25 = vld [vmem:[%s1522_s19 + $0x98] sm:$0xff]  ;;  %v377_v27 = vld [vmem:[%s1522_s19 + $0x90] sm:$0xff]  ;;  %v376_v29 = vld [vmem:[%s1522_s19 + $0x88] sm:$0xff] }
  0x9a   : > { %802 = vmatprep.subr.mxu0 %v386_v9  ;;  %878 = vmatprep.subr.mxu1 %v386_v9  ;;  %v362_v26 = vld [vmem:[%s1522_s19 + $0x18] sm:$0xff]  ;;  %v361_v28 = vld [vmem:[%s1522_s19 + $0x10] sm:$0xff]  ;;  %v360_v30 = vld [vmem:[%s1522_s19 + $0x8] sm:$0xff] }
  0x9b   : > { %803 = vmatpush3.msra.mxu0 %v370_v10  ;;  %894 = vmatpush3.msra.mxu1 %v370_v10  ;;  %v375_v31 = vld [vmem:[%s1522_s19 + $0x80] sm:$0xff]  ;;  %v328_v33 = vld [vmem:[%s1515_s4 + $0x8] sm:$0xff]  ;;  %v330_v37 = vld [vmem:[%s1515_s4 + $0x18] sm:$0xff] }
  0x9c   : > { %804 = vmatprep.subr.mxu0 %v385_v11  ;;  %879 = vmatprep.subr.mxu1 %v385_v11  ;;  %v359_v32 = vld [vmem:[%s1522_s19] sm:$0xff]  ;;  %v344_v34 = vld [vmem:[%s1515_s4 + $0x88] sm:$0xff]  ;;  %v346_v38 = vld [vmem:[%s1515_s4 + $0x98] sm:$0xff] }
  0x9d   : > { %805 = vmatpush3.msra.mxu0 %v369_v12  ;;  %895 = vmatpush3.msra.mxu1 %v369_v12  ;;  %v327_v35 = vld [vmem:[%s1515_s4] sm:$0xff]  ;;  %v329_v39 = vld [vmem:[%s1515_s4 + $0x10] sm:$0xff]  ;;  %v332_v41 = vld [vmem:[%s1515_s4 + $0x28] sm:$0xff] }
  0x9e   : > { %806 = vmatprep.subr.mxu0 %v384_v13  ;;  %880 = vmatprep.subr.mxu1 %v384_v13  ;;  %v343_v36 = vld [vmem:[%s1515_s4 + $0x80] sm:$0xff]  ;;  %v345_v40 = vld [vmem:[%s1515_s4 + $0x90] sm:$0xff]  ;;  %v348_v42 = vld [vmem:[%s1515_s4 + $0xa8] sm:$0xff] }
  0x9f   : > { %807 = vmatpush3.msra.mxu0 %v368_v14  ;;  %896 = vmatpush3.msra.mxu1 %v368_v14  ;;  %v331_v43 = vld [vmem:[%s1515_s4 + $0x20] sm:$0xff]  ;;  %v334_v45 = vld [vmem:[%s1515_s4 + $0x38] sm:$0xff]  ;;  %v333_v47 = vld [vmem:[%s1515_s4 + $0x30] sm:$0xff] }
  0xa0   : > { %808 = vmatprep.subr.mxu0 %v383_v15  ;;  %881 = vmatprep.subr.mxu1 %v383_v15  ;;  %v347_v44 = vld [vmem:[%s1515_s4 + $0xa0] sm:$0xff]  ;;  %v350_v46 = vld [vmem:[%s1515_s4 + $0xb8] sm:$0xff]  ;;  %v349_v48 = vld [vmem:[%s1515_s4 + $0xb0] sm:$0xff] }
  0xa1   : > { %809 = vmatpush3.msra.mxu0 %v367_v16  ;;  %897 = vmatpush3.msra.mxu1 %v367_v16  ;;  %v336_v49 = vld [vmem:[%s1515_s4 + $0x48] sm:$0xff]  ;;  %v335_v51 = vld [vmem:[%s1515_s4 + $0x40] sm:$0xff]  ;;  %v338_v53 = vld [vmem:[%s1515_s4 + $0x58] sm:$0xff] }
  0xa2   : > { %810 = vmatprep.subr.mxu0 %v382_v17  ;;  %882 = vmatprep.subr.mxu1 %v382_v17  ;;  %v352_v50 = vld [vmem:[%s1515_s4 + $0xc8] sm:$0xff]  ;;  %v351_v52 = vld [vmem:[%s1515_s4 + $0xc0] sm:$0xff]  ;;  %v354_v54 = vld [vmem:[%s1515_s4 + $0xd8] sm:$0xff] }
  0xa3   : > { %811 = vmatpush3.msra.mxu0 %v366_v18  ;;  %898 = vmatpush3.msra.mxu1 %v366_v18  ;;  %v337_v55 = vld [vmem:[%s1515_s4 + $0x50] sm:$0xff]  ;;  %v340_v57 = vld [vmem:[%s1515_s4 + $0x68] sm:$0xff]  ;;  %v339_v59 = vld [vmem:[%s1515_s4 + $0x60] sm:$0xff] }
  0xa4   : > { %812 = vmatprep.subr.mxu0 %v381_v19  ;;  %883 = vmatprep.subr.mxu1 %v381_v19  ;;  %v353_v56 = vld [vmem:[%s1515_s4 + $0xd0] sm:$0xff]  ;;  %v356_v58 = vld [vmem:[%s1515_s4 + $0xe8] sm:$0xff]  ;;  %v355_v60 = vld [vmem:[%s1515_s4 + $0xe0] sm:$0xff] }
  0xa5   : > { %813 = vmatpush3.msra.mxu0 %v365_v20  ;;  %899 = vmatpush3.msra.mxu1 %v365_v20  ;;  %v342_v61 = vld [vmem:[%s1515_s4 + $0x78] sm:$0xff]  ;;  %v341_v63 = vld [vmem:[%s1515_s4 + $0x70] sm:$0xff]  ;;  %v319_v5 = vld [vmem:[#allocation2 + $0x40] sm:$0xff] }
  0xa6   : > { %814 = vmatprep.subr.mxu0 %v380_v21  ;;  %884 = vmatprep.subr.mxu1 %v380_v21  ;;  %v358_v62 = vld [vmem:[%s1515_s4 + $0xf8] sm:$0xff]  ;;  %v357_v0 = vld [vmem:[%s1515_s4 + $0xf0] sm:$0xff]  ;;  %v312_v13 = vld [vmem:[#allocation2] sm:$0xff] }
  0xa7   : > { %815 = vmatpush3.msra.mxu0 %v364_v22  ;;  %900 = vmatpush3.msra.mxu1 %v364_v22  ;;  %v311_v3 = vld [vmem:[#allocation2 + $0x30] sm:$0xff]  ;;  %v320_v15 = vld [vmem:[#allocation2 + $0x20] sm:$0xff] }
  0xa8   : > { %816 = vmatprep.subr.mxu0 %v379_v23  ;;  %885 = vmatprep.subr.mxu1 %v379_v23  ;;  %v313_v23 = vld [vmem:[#allocation2 + $0x58] sm:$0xff] }
  0xa9   : > { %817 = vmatpush3.msra.mxu0 %v363_v24  ;;  %901 = vmatpush3.msra.mxu1 %v363_v24 }
  0xaa   : > { %818 = vmatprep.subr.mxu0 %v378_v25  ;;  %886 = vmatprep.subr.mxu1 %v378_v25  ;;  %v321_v25 = vld [vmem:[#allocation2 + $0x10] sm:$0xff] }
  0xab   : > { %819 = vmatpush3.msra.mxu0 %v362_v26  ;;  %902 = vmatpush3.msra.mxu1 %v362_v26 }
  0xac   : > { %820 = vmatprep.subr.mxu0 %v377_v27  ;;  %887 = vmatprep.subr.mxu1 %v377_v27 }
  0xad   : > { %821 = vmatpush3.msra.mxu0 %v361_v28  ;;  %903 = vmatpush3.msra.mxu1 %v361_v28 }
  0xae   : > { %822 = vmatprep.subr.mxu0 %v376_v29  ;;  %888 = vmatprep.subr.mxu1 %v376_v29 }
  0xaf   : > { %823 = vmatpush3.msra.mxu0 %v360_v30  ;;  %904 = vmatpush3.msra.mxu1 %v360_v30 }
  0xb0   : > { %824 = vmatprep.subr.mxu0 %v375_v31  ;;  %889 = vmatprep.subr.mxu1 %v375_v31 }
  0xb1   : > { %825 = vmatpush3.msra.mxu0 %v359_v32  ;;  %905 = vmatpush3.msra.mxu1 %v359_v32 }
  0xb2   : > { %455 = vmatprep.mubr.f32.mxu0 %v328_v33  ;;  %495 = vmatprep.mubr.f32.mxu1 %v344_v34  ;;  %v314_v33 = vld [vmem:[#allocation2 + $0x18] sm:$0xff] }
  0xb3   : > { %456 = vmatmul.mubr.f32.vlgmr.msra.gmra.mxu0 %v327_v35  ;;  %496 = vmatmul.mubr.f32.vlgmr.msra.gmra.mxu1 %v343_v36  ;;  %v322_v35 = vld [vmem:[#allocation2 + $0x38] sm:$0xff] }
  0xb4   : > { %460 = vmatprep.mubr.f32.mxu0 %v330_v37  ;;  %500 = vmatprep.mubr.f32.mxu1 %v346_v38 }
  0xb7   : > { %461 = vmatmul.mubr.f32.gmra.mxu0 %v329_v39  ;;  %501 = vmatmul.mubr.f32.gmra.mxu1 %v345_v40 }
  0xb8   : > { %465 = vmatprep.mubr.f32.mxu0 %v332_v41  ;;  %505 = vmatprep.mubr.f32.mxu1 %v348_v42 }
  0xbb   : > { %466 = vmatmul.mubr.f32.gmra.mxu0 %v331_v43  ;;  %506 = vmatmul.mubr.f32.gmra.mxu1 %v347_v44  ;;  %v315_v43 = vld [vmem:[#allocation2 + $0x50] sm:$0xff] }
  0xbc   : > { %470 = vmatprep.mubr.f32.mxu0 %v334_v45  ;;  %510 = vmatprep.mubr.f32.mxu1 %v350_v46  ;;  %v323_v45 = vld [vmem:[#allocation2 + $0x60] sm:$0xff] }
  0xbf   : > { %471 = vmatmul.mubr.f32.gmra.mxu0 %v333_v47  ;;  %511 = vmatmul.mubr.f32.gmra.mxu1 %v349_v48 }
  0xc0   : > { %475 = vmatprep.mubr.f32.mxu0 %v336_v49  ;;  %515 = vmatprep.mubr.f32.mxu1 %v352_v50 }
  0xc3   : > { %476 = vmatmul.mubr.f32.gmra.mxu0 %v335_v51  ;;  %516 = vmatmul.mubr.f32.gmra.mxu1 %v351_v52 }
  0xc4   : > { %480 = vmatprep.mubr.f32.mxu0 %v338_v53  ;;  %520 = vmatprep.mubr.f32.mxu1 %v354_v54  ;;  %v316_v53 = vld [vmem:[#allocation2 + $0x68] sm:$0xff] }
  0xc7   : > { %481 = vmatmul.mubr.f32.gmra.mxu0 %v337_v55  ;;  %521 = vmatmul.mubr.f32.gmra.mxu1 %v353_v56  ;;  %v324_v55 = vld [vmem:[#allocation2 + $0x70] sm:$0xff] }
  0xc8   : > { %485 = vmatprep.mubr.f32.mxu0 %v340_v57  ;;  %525 = vmatprep.mubr.f32.mxu1 %v356_v58 }
  0xcb   : > { %486 = vmatmul.mubr.f32.gmra.mxu0 %v339_v59  ;;  %526 = vmatmul.mubr.f32.gmra.mxu1 %v355_v60 }
  0xcc   : > { %490 = vmatprep.mubr.f32.mxu0 %v342_v61  ;;  %530 = vmatprep.mubr.f32.mxu1 %v358_v62 }
  0xcf   : > { %491 = vmatmul.mubr.f32.gmra.mxu0 %v341_v63  ;;  %531 = vmatmul.mubr.f32.gmra.mxu1 %v357_v0  ;;  %v317_v63 = vld [vmem:[#allocation2 + $0x8] sm:$0xff] }
 0x173   : > { %v826_v1 = vpop.f32.mrf.mxu0  ;;  %v850_v2 = vpop.f32.mrf.mxu1 }
 0x175   : > { %v827_v4 = vpop.f32.mrf.mxu0  ;;  %v851_v6 = vpop.f32.mrf.mxu1 }
 0x176   : > { %v828_v7 = vadd.f32 %v827_v4, %v826_v1  ;;  %v852_v8 = vadd.f32 %v851_v6, %v850_v2  ;;  %v325_v1 = vld [vmem:[#allocation2 + $0x78] sm:$0xff] }
 0x177   : > { %v829_v9 = vpop.f32.mrf.mxu0  ;;  %v853_v10 = vpop.f32.mrf.mxu1 }
 0x178   : > { %v536_v11 = vadd.f32 %v828_v7, %v311_v3  ;;  %v544_v12 = vadd.f32 %v852_v8, %v319_v5 }
 0x179   : > { %v830_v14 = vpop.f32.mrf.mxu0  ;;  %v854_v16 = vpop.f32.mrf.mxu1 }
 0x17a   : > { %552 = vst [vmem:[#allocation2 + $0x30] sm:$0xff] %v536_v11  ;;  %560 = vst [vmem:[#allocation2 + $0x40] sm:$0xff] %v544_v12  ;;  %v831_v17 = vadd.f32 %v830_v14, %v829_v9  ;;  %v855_v18 = vadd.f32 %v854_v16, %v853_v10  ;;  %v318_v9 = vld [vmem:[#allocation2 + $0x48] sm:$0xff] }
 0x17b   : > { %v832_v19 = vpop.f32.mrf.mxu0  ;;  %v856_v20 = vpop.f32.mrf.mxu1  ;;  %v326_v11 = vld [vmem:[#allocation2 + $0x28] sm:$0xff] }
 0x17c   : > { %v537_v21 = vadd.f32 %v831_v17, %v312_v13  ;;  %v545_v22 = vadd.f32 %v855_v18, %v320_v15 }
 0x17d   : > { %v833_v24 = vpop.f32.mrf.mxu0  ;;  %v857_v26 = vpop.f32.mrf.mxu1 }
 0x17e   : > { %553 = vst [vmem:[#allocation2] sm:$0xff] %v537_v21  ;;  %561 = vst [vmem:[#allocation2 + $0x20] sm:$0xff] %v545_v22  ;;  %v834_v27 = vadd.f32 %v833_v24, %v832_v19  ;;  %v858_v28 = vadd.f32 %v857_v26, %v856_v20 }
 0x17f   : > { %v835_v29 = vpop.f32.mrf.mxu0  ;;  %v859_v30 = vpop.f32.mrf.mxu1 }
 0x180   : > { %v538_v31 = vadd.f32 %v834_v27, %v313_v23  ;;  %v546_v32 = vadd.f32 %v858_v28, %v321_v25 }
 0x181   : > { %v836_v34 = vpop.f32.mrf.mxu0  ;;  %v860_v36 = vpop.f32.mrf.mxu1 }
 0x182   : > { %554 = vst [vmem:[#allocation2 + $0x58] sm:$0xff] %v538_v31  ;;  %562 = vst [vmem:[#allocation2 + $0x10] sm:$0xff] %v546_v32  ;;  %v837_v37 = vadd.f32 %v836_v34, %v835_v29  ;;  %v861_v38 = vadd.f32 %v860_v36, %v859_v30 }
 0x183   : > { %v838_v39 = vpop.f32.mrf.mxu0  ;;  %v862_v40 = vpop.f32.mrf.mxu1 }
 0x184   : > { %v539_v41 = vadd.f32 %v837_v37, %v314_v33  ;;  %v547_v42 = vadd.f32 %v861_v38, %v322_v35 }
 0x185   : > { %v839_v44 = vpop.f32.mrf.mxu0  ;;  %v863_v46 = vpop.f32.mrf.mxu1 }
 0x186   : > { %555 = vst [vmem:[#allocation2 + $0x18] sm:$0xff] %v539_v41  ;;  %563 = vst [vmem:[#allocation2 + $0x38] sm:$0xff] %v547_v42  ;;  %v840_v47 = vadd.f32 %v839_v44, %v838_v39  ;;  %v864_v48 = vadd.f32 %v863_v46, %v862_v40 }
 0x187   : > { %v841_v49 = vpop.f32.mrf.mxu0  ;;  %v865_v50 = vpop.f32.mrf.mxu1 }
 0x188   : > { %v540_v51 = vadd.f32 %v840_v47, %v315_v43  ;;  %v548_v52 = vadd.f32 %v864_v48, %v323_v45 }
 0x189   : > { %v842_v54 = vpop.f32.mrf.mxu0  ;;  %v866_v56 = vpop.f32.mrf.mxu1 }
 0x18a   : > { %556 = vst [vmem:[#allocation2 + $0x50] sm:$0xff] %v540_v51  ;;  %564 = vst [vmem:[#allocation2 + $0x60] sm:$0xff] %v548_v52  ;;  %v843_v57 = vadd.f32 %v842_v54, %v841_v49  ;;  %v867_v58 = vadd.f32 %v866_v56, %v865_v50 }
 0x18b   : > { %v844_v59 = vpop.f32.mrf.mxu0  ;;  %v868_v60 = vpop.f32.mrf.mxu1 }
 0x18c   : > { %v541_v61 = vadd.f32 %v843_v57, %v316_v53  ;;  %v549_v62 = vadd.f32 %v867_v58, %v324_v55 }
 0x18d   : > { %v845_v0 = vpop.f32.mrf.mxu0  ;;  %v869_v2 = vpop.f32.mrf.mxu1 }
 0x18e   : > { %557 = vst [vmem:[#allocation2 + $0x68] sm:$0xff] %v541_v61  ;;  %565 = vst [vmem:[#allocation2 + $0x70] sm:$0xff] %v549_v62  ;;  %v846_v3 = vadd.f32 %v845_v0, %v844_v59  ;;  %v870_v4 = vadd.f32 %v869_v2, %v868_v60 }
 0x18f   : > { %v847_v5 = vpop.f32.mrf.mxu0  ;;  %v871_v6 = vpop.f32.mrf.mxu1 }
 0x190   : > { %v542_v7 = vadd.f32 %v846_v3, %v317_v63  ;;  %v550_v8 = vadd.f32 %v870_v4, %v325_v1 }
 0x191   : > { %v848_v10 = vpop.f32.mrf.mxu0  ;;  %v872_v12 = vpop.f32.mrf.mxu1 }
 0x192   : > { %558 = vst [vmem:[#allocation2 + $0x8] sm:$0xff] %v542_v7  ;;  %566 = vst [vmem:[#allocation2 + $0x78] sm:$0xff] %v550_v8  ;;  %v849_v13 = vadd.f32 %v848_v10, %v847_v5  ;;  %v873_v14 = vadd.f32 %v872_v12, %v871_v6 }
 0x194   : > { %v543_v15 = vadd.f32 %v849_v13, %v318_v9  ;;  %v551_v16 = vadd.f32 %v873_v14, %v326_v11 }
 0x196   : > { %559 = vst [vmem:[#allocation2 + $0x48] sm:$0xff] %v543_v15  ;;  %567 = vst [vmem:[#allocation2 + $0x28] sm:$0xff] %v551_v16 }
 0x197 PF: > { %s1755_s4 = sld [smem:[#allocation16_spill]] }
 0x19d   : > { %p787_p12 = scmp.ne.s32.totalorder %s1755_s4, 1 }
 0x19f   : > { %571 = sbr.rel (%p787_p12) target bundleno = 431 (0x1af), region = 52 }
 0x1a4   : > { %v572_v17 = vld [vmem:[#allocation2 + $0x30] sm:$0xff]  ;;  %v788_v18 = vld [vmem:[%s282_s3] ss:$0 sm:$0xff]  ;;  %v574_v22 = vld [vmem:[#allocation2 + $0x58] sm:$0xff] }
 0x1a5   : > { %v573_v19 = vld [vmem:[#allocation2] sm:$0xff]  ;;  %v595_v20 = vadd.f32 %v788_v18, %v572_v17  ;;  %v575_v23 = vld [vmem:[#allocation2 + $0x18] sm:$0xff]  ;;  %v576_v24 = vld [vmem:[#allocation2 + $0x50] sm:$0xff]  ;;  %v597_v25 = vadd.f32 %v788_v18, %v574_v22 }
 0x1a6   : > { %v596_v21 = vadd.f32 %v788_v18, %v573_v19  ;;  %v598_v26 = vadd.f32 %v788_v18, %v575_v23  ;;  %v599_v27 = vadd.f32 %v788_v18, %v576_v24  ;;  %v577_v28 = vld [vmem:[#allocation2 + $0x68] sm:$0xff]  ;;  %v580_v34 = vld [vmem:[#allocation2 + $0x40] sm:$0xff]  ;;  %v582_v36 = vld [vmem:[#allocation2 + $0x10] sm:$0xff] }
 0x1a7   : > { %v578_v29 = vld [vmem:[#allocation2 + $0x8] sm:$0xff]  ;;  %611 = vst [vmem:[%s1539_s25] sm:$0xff] %v595_v20  ;;  %v600_v31 = vadd.f32 %v788_v18, %v577_v28  ;;  %v581_v35 = vld [vmem:[#allocation2 + $0x20] sm:$0xff]  ;;  %613 = vst [vmem:[%s1539_s25 + $0x10] sm:$0xff] %v597_v25  ;;  %v603_v37 = vadd.f32 %v788_v18, %v580_v34  ;;  %v605_v39 = vadd.f32 %v788_v18, %v582_v36 }
 0x1a8   : > { %v579_v30 = vld [vmem:[#allocation2 + $0x48] sm:$0xff]  ;;  %612 = vst [vmem:[%s1539_s25 + $0x8] sm:$0xff] %v596_v21  ;;  %v601_v32 = vadd.f32 %v788_v18, %v578_v29  ;;  %614 = vst [vmem:[%s1539_s25 + $0x18] sm:$0xff] %v598_v26  ;;  %v604_v38 = vadd.f32 %v788_v18, %v581_v35  ;;  %v583_v40 = vld [vmem:[#allocation2 + $0x38] sm:$0xff] }
 0x1a9   : > { %v602_v33 = vadd.f32 %v788_v18, %v579_v30  ;;  %615 = vst [vmem:[%s1539_s25 + $0x20] sm:$0xff] %v599_v27  ;;  %v584_v41 = vld [vmem:[#allocation2 + $0x60] sm:$0xff]  ;;  %v585_v42 = vld [vmem:[#allocation2 + $0x70] sm:$0xff]  ;;  %616 = vst [vmem:[%s1539_s25 + $0x28] sm:$0xff] %v600_v31  ;;  %v606_v43 = vadd.f32 %v788_v18, %v583_v40 }
 0x1aa   : > { %617 = vst [vmem:[%s1539_s25 + $0x30] sm:$0xff] %v601_v32  ;;  %v607_v44 = vadd.f32 %v788_v18, %v584_v41  ;;  %v608_v45 = vadd.f32 %v788_v18, %v585_v42  ;;  %v586_v46 = vld [vmem:[#allocation2 + $0x78] sm:$0xff]  ;;  %v587_v47 = vld [vmem:[#allocation2 + $0x28] sm:$0xff]  ;;  %619 = vst [vmem:[%s1539_s25 + $0x40] sm:$0xff] %v603_v37 }
 0x1ab   : > { %618 = vst [vmem:[%s1539_s25 + $0x38] sm:$0xff] %v602_v33  ;;  %620 = vst [vmem:[%s1539_s25 + $0x48] sm:$0xff] %v604_v38  ;;  %v609_v48 = vadd.f32 %v788_v18, %v586_v46  ;;  %v610_v49 = vadd.f32 %v788_v18, %v587_v47 }
 0x1ac   : > { %621 = vst [vmem:[%s1539_s25 + $0x50] sm:$0xff] %v605_v39  ;;  %622 = vst [vmem:[%s1539_s25 + $0x58] sm:$0xff] %v606_v43 }
 0x1ad   : > { %623 = vst [vmem:[%s1539_s25 + $0x60] sm:$0xff] %v607_v44  ;;  %624 = vst [vmem:[%s1539_s25 + $0x68] sm:$0xff] %v608_v45 }
 0x1ae   : > { %625 = vst [vmem:[%s1539_s25 + $0x70] sm:$0xff] %v609_v48  ;;  %626 = vst [vmem:[%s1539_s25 + $0x78] sm:$0xff] %v610_v49 }
 0x1af PF: > { %s790_s15 = sshll.u32 %s1255_s29, 7  ;;  %s1757_s17 = sld [smem:[#allocation23_spill]] }
 0x1b0   : > { %s643_s3 = sshll.u32 %s1539_s25, 4  ;;  %s1641_s28 = scalar_lea.sflag [#allocation7], %s274_s16  ;;  %s1637_s3 = int_to_ptr.vmem [resolvable:$true] %s643_s3 }
 0x1b1   : > { %s1117_s7 = scalar_lea.vmem %s1637_s3, 2048  ;;  %s1279_s29 = smov [#allocation10]  }
 0x1b2   : > { %p1118_p3 = scmp.ne.s32.totalorder %s1637_s3, %s1117_s7  ;;  %s1121_s22 = sshll.u32 %s1279_s29, 4  ;;  %s1122_s22 = int_to_ptr.vmem [resolvable:$false] %s1121_s22 }
 0x1b3   : > { %s1123_s9 = scalar_lea.vmem %s1122_s22, 4096  ;;  %p1124_p0 = scmp.lt.s32.totalorder %s1637_s3, %s1122_s22 }
 0x1b4   : > { %p1119_p5 = pnand %p1118_p3, %p1480_p4  ;;  %p1125_p6 = scmp.lt.s32.totalorder %s1123_s9, %s1117_s7 }
 0x1b5   : > { %s1634_s11 = scalar_lea.hbm %s1757_s17, %s790_s15 }
 0x1b6   : > { %p1120_p11 = pneg %p1119_p5  ;;  %p1126_p7 = por %p1125_p6, %p1124_p0 }
 0x1b8   : > { %p1127_p8 = pnand %p1126_p7, %p1120_p11 }
 0x1ba   : > { %1130 = shalt.err (!%p1127_p8)
}
 0x1bb   : > { %s1131_s16 = scalar_lea.hbm %s1634_s11, 2048  ;;  %s1135_s4 = scalar_lea.hbm %s1757_s17, 6144 }
 0x1bc   : > { %p1132_p2 = scmp.ne.s32.totalorder %s1634_s11, %s1131_s16  ;;  %p1136_p9 = scmp.lt.s32.totalorder %s1634_s11, %s1757_s17 }
 0x1bd   : > { %p1137_p12 = scmp.lt.s32.totalorder %s1135_s4, %s1131_s16 }
 0x1be   : > { %p1133_p13 = pnand %p1132_p2, %p1480_p4 }
 0x1bf   : > { %p1138_p3 = por %p1137_p12, %p1136_p9 }
 0x1c0   : > { %p1134_p1 = pneg %p1133_p13 }
 0x1c2   : > { %p1139_p5 = pnand %p1138_p3, %p1134_p1 }
 0x1c4   : > { %1142 = shalt.err (!%p1139_p5)
}
 0x1c5   : > { %s1280_s19 = smov 128   ;;  %s1281_s15 = smov 384  }
 0x1c6   : > { %s1282_s12 = smov 8  }
 0x1c7   : > { %911 = dma.vmem_to_hbm [thread:$0]  (%p1480_p4), %s1637_s3, 2048, %s1634_s11, %s1641_s28, %s1280_s19, %s1281_s15, %s1282_s12  }
 0x1c8 PF: > { %p925_p11 = scmp.ge.s32.totalorder %s1267_s6, 2  ;;  %s658_s27 = sand.u32 1, %s1215_s0  }
 0x1c9   : > { %s659_s7 = scalar_lea.sflag [#allocation7], %s658_s27 }
 0x1ca   : > { %p921_p0 = pnand %p925_p11, %p1490_p10 }
 0x1cc   : > { %p922_p6 = pneg %p921_p0 }
 0x1ce   : > { %1210 = dma.done.wait (%p922_p6), %s659_s7, 2048  }
 0x1cf   : > { %1212 = vsyncadd (%p922_p6), %s659_s7, 4294965248  ;;  %s29_s6 = sadd.s32 1, %s1267_s6   ;;  %s1759_s13 = sld [smem:[#allocation15_spill]] }
 0x1d0   : > { %p1669_p7 = scmp.ge.s32.totalorder %s29_s6, 8   ;;  %s1760_s27 = sld [smem:[#allocation19_spill]] }
 0x1d1   : > { %s1761_s28 = sld [smem:[#allocation17_spill]]  ;;  %s1765_s0 = smov %s1219_s20 }
 0x1d2   : > { %s1762_s30 = sld [smem:[#allocation18_spill]]  ;;  %s1766_s20 = smov %s1223_s21 }
 0x1d3   : > { %s1763_s18 = sld [smem:[#allocation20_spill]]  ;;  %s1767_s21 = smov %s1485_s10 }
 0x1d4   : > { %s1768_s22 = smov %s1231_s23  ;;  %s1769_s23 = smov %s1235_s24 }
 0x1d5   : > { %s1770_s24 = smov %s1488_s8  ;;  %s1771_s25 = smov %s1243_s26 }
 0x1d6   : > { %s1772_s26 = smov %s1759_s13  ;;  %s1773_s29 = smov %s1263_s5 }
 0x1d7   :  { %28 = sbr.rel (!%p1669_p7) target bundleno = 28 (0x1c), region = 105 }
 0x1d9   : > { %s1774_s5 = smov %s1763_s18 }
 0x1dc   :  { %664 = vsyncpa [#allocation6], 1 }
 0x1dd   :  { %666 = vsyncpa [#allocation6 + $0x1], 1 }
 0x1de   :  { %667 = vsyncpa [#allocation9], 1 }
 0x1df   :  { %669 = vsyncpa [#allocation9 + $0x1], 1 }
 0x1e0   :  { %670 = vsyncpa [#allocation7], 1 }
 0x1e1   :  { %672 = vsyncpa [#allocation7 + $0x1], 1 }

</bundles_post_ra>
